<compile_context>
chip_gen: v6e
topology: v6e:2x2x1
jax: 0.10.0
libtpu: 0.0.40
codegen_flags: <defaults>
</compile_context>

<pallas_src>
import functools

import jax
import jax.numpy as jnp
from jax import lax
from jax.experimental import pallas as pl
from jax.experimental.pallas import tpu as pltpu

LANE = 128


def _round_up(v, m):
    return (v + m - 1) // m * m


# ----------------------------------------------------------------------------
# Fused Pallas kernel: Conv(as matmul) + bias + ReLU -> VMEM slab -> Flatten +
# Gemm + bias.  One invocation, no grid, everything resident in VMEM.
# ----------------------------------------------------------------------------
def _fused_conv_gemm_kernel(patchesT_ref, conv_wT_ref, conv_b_ref,
                            fc_w_ref, fc_b_ref, out_ref, act_ref,
                            *, n_batch, hw, c_out):
    # ---- Conv, transposed orientation: act[c, n*HW + p] ---------------------
    # Per-sample matmuls bound the f32 intermediate to (Cout_pad, HW).
    for n in range(n_batch):                                    # static unroll
        a = jnp.dot(conv_wT_ref[...],
                    patchesT_ref[:, n * hw:(n + 1) * hw],
                    preferred_element_type=jnp.float32)         # (Cpad, HW) f32
        a = jnp.maximum(a + conv_b_ref[...], 0.0)               # bias + ReLU
        act_ref[:, n * hw:(n + 1) * hw] = a.astype(act_ref.dtype)

    # ---- Flatten + Gemm (fused): logits[n,k] = sum_{c,p} act[c,n*HW+p]*W[c,p,k]
    # Static loop over the *real* channels only; each step is a clean
    # (N, HW) @ (HW, ncls_pad) MXU matmul accumulated in f32.
    acc = jnp.zeros(out_ref.shape, jnp.float32)
    for c in range(c_out):                                      # static unroll
        rows = [act_ref[c:c + 1, n * hw:(n + 1) * hw] for n in range(n_batch)]
        a_c = jnp.concatenate(rows, axis=0)                     # (N, HW) bf16
        acc = acc + jnp.dot(a_c, fc_w_ref[c],
                            preferred_element_type=jnp.float32)
    out_ref[...] = acc + fc_b_ref[...]                          # (N, ncls_pad)


# ----------------------------------------------------------------------------
# ONNX-node equivalent (the "rebuild_op" result): the Conv->Relu->Flatten->Gemm
# chain compiled into one fused Pallas node.
# ----------------------------------------------------------------------------
def make_fused_conv_relu_flatten_gemm_node(*, c_in, c_out, kh, kw, pad, n_cls):
    # TODO(synk): stride/dilation != 1 (generic ONNX Conv attrs) not implemented.

    def fused_op(x, conv_wT, conv_b, fc_w, fc_b):
        n, _, h, w = x.shape
        hw = h * w
        k = c_in * kh * kw
        cout_pad, k_pad = conv_wT.shape
        ncls_pad = fc_b.shape[1]

        # im2col glue (XLA, fused under jit): NHWC once, bf16 before pad,
        # patches built directly in the transposed (K_pad, N*H*W) layout.
        # TODO(synk): for large H/W/Cin build patches on-chip (shifted reads /
        # pltpu.roll) instead of XLA-side im2col (9x read amplification).
        x_nhwc = jnp.transpose(x, (0, 2, 3, 1)).astype(jnp.bfloat16)
        xp = jnp.pad(x_nhwc, ((0, 0), (pad, pad), (pad, pad), (0, 0)))
        taps = [xp[:, di:di + h, dj:dj + w, :]
                for di in range(kh) for dj in range(kw)]
        patches = jnp.concatenate(taps, axis=-1).reshape(n * hw, k)
        patchesT = jnp.pad(patches.T, ((0, k_pad - k), (0, 0)))  # (K_pad, N*HW)

        kernel = functools.partial(_fused_conv_gemm_kernel,
                                   n_batch=n, hw=hw, c_out=c_out)
        logits_pad = pl.pallas_call(
            kernel,
            out_shape=jax.ShapeDtypeStruct((n, ncls_pad), jnp.float32),
            # Whole-array VMEM blocks, single invocation: ~0.8 MB of operands,
            # so no tiling / pipelining is needed on any generation.
            scratch_shapes=[pltpu.VMEM((cout_pad, n * hw), jnp.bfloat16)],
        )(patchesT, conv_wT, conv_b, fc_w, fc_b)
        return logits_pad[:, :n_cls]            # drop padded class columns

    return fused_op


# ----------------------------------------------------------------------------
# unpack_weights equivalent: one-time pad / permute / cast of the initializers
# into the lane-dense layouts the fused kernel consumes.
# ----------------------------------------------------------------------------
def preprocess_weights(raw, *, c_in, c_out, kh, kw, h, w, n_cls):
    k = c_in * kh * kw
    k_pad = _round_up(k, LANE)
    cout_pad = _round_up(c_out, LANE)
    ncls_pad = _round_up(n_cls, LANE)

    # Conv weight -> (Cout_pad, K_pad); K is tap-major / cin-minor to match the
    # patch concatenation order used in fused_op.
    wmat = raw["conv_w"].transpose(2, 3, 1, 0).reshape(k, c_out)      # (K, Cout)
    conv_wT = jnp.pad(wmat.T, ((0, cout_pad - c_out), (0, k_pad - k)))
    conv_b = jnp.pad(raw["conv_b"], (0, cout_pad - c_out)).reshape(cout_pad, 1)

    # FC weight (n_cls, Cout*H*W) in NCHW-flatten order -> per-channel
    # (Cout, HW, ncls_pad) so the kernel contracts one 256-deep matmul per
    # real channel.  Classes padded to 128 for a lane-dense logits block.
    fc_w = raw["fc_w"].reshape(n_cls, c_out, h * w).transpose(1, 2, 0)
    fc_w = jnp.pad(fc_w, ((0, 0), (0, 0), (0, ncls_pad - n_cls)))
    fc_b = jnp.pad(raw["fc_b"], (0, ncls_pad - n_cls)).reshape(1, ncls_pad)

    return {
        "conv_wT": conv_wT.astype(jnp.bfloat16),
        "conv_b": conv_b.astype(jnp.float32),
        "fc_w": fc_w.astype(jnp.bfloat16),
        "fc_b": fc_b.astype(jnp.float32),
    }


# ----------------------------------------------------------------------------
# DependencyModule equivalent: deps dict + recursive resolve_deps.
# ----------------------------------------------------------------------------
class DependencyModuleJAX:
    def __init__(self, weights, nodes, input_name, output_name):
        self.weights = weights
        self.deps = {}
        for op, inputs, outputs in nodes:
            for out_name in outputs:
                self.deps[out_name] = (op, inputs)
        self.input_name = input_name
        self.output_name = output_name

    def _resolve(self, name, inter_tensors):
        if name in inter_tensors:
            return
        op, dep_names = self.deps[name]
        args = []
        for dep_name in dep_names:
            self._resolve(dep_name, inter_tensors)
            args.append(inter_tensors[dep_name])
        inter_tensors[name] = op(*args)

    def __call__(self, x):
        inter_tensors = dict(self.weights)               # weights.copy()
        inter_tensors[self.input_name] = x
        self._resolve(self.output_name, inter_tensors)
        return inter_tensors[self.output_name]


# ----------------------------------------------------------------------------
# Main
# ----------------------------------------------------------------------------
if __name__ == "__main__":
    key = jax.random.PRNGKey(0)
    k_in, k_w1, k_b1, k_w2, k_b2 = jax.random.split(key, 5)

    N, Cin, H, W = 2, 4, 16, 16
    Cout, n_cls = 8, 10
    kh = kw = 3

    x = jax.random.normal(k_in, (N, Cin, H, W), jnp.float32)

    # Deterministic synthetic "initializer" weights (what unpack_weights yields)
    raw_weights = {
        "conv_w": jax.random.normal(k_w1, (Cout, Cin, kh, kw), jnp.float32) * 0.1,
        "conv_b": jax.random.normal(k_b1, (Cout,), jnp.float32) * 0.1,
        "fc_w": jax.random.normal(k_w2, (n_cls, Cout * H * W), jnp.float32) * 0.02,
        "fc_b": jax.random.normal(k_b2, (n_cls,), jnp.float32) * 0.02,
    }
    weights = preprocess_weights(raw_weights, c_in=Cin, c_out=Cout, kh=kh,
                                 kw=kw, h=H, w=W, n_cls=n_cls)

    # Synthetic graph (what construct_pytorch_nodes would produce).  The ONNX
    # node chain Conv -> Relu -> Flatten -> Gemm is compiled into one fused
    # Pallas node; the dependency-resolution machinery is unchanged.
    nodes = [
        (make_fused_conv_relu_flatten_gemm_node(
            c_in=Cin, c_out=Cout, kh=kh, kw=kw, pad=1, n_cls=n_cls),
         ["input", "conv_wT", "conv_b", "fc_w", "fc_b"], ["output"]),
    ]

    model = DependencyModuleJAX(weights, nodes, "input", "output")
    fwd = jax.jit(model.__call__)
    out = jax.block_until_ready(fwd(x))

    # Pure-JAX reference (same bf16-quantized operands, f32 math/accumulate)
    bf = lambda t: t.astype(jnp.bfloat16).astype(jnp.float32)
    ref_conv = lax.conv_general_dilated(
        bf(x), bf(raw_weights["conv_w"]), window_strides=(1, 1),
        padding=((1, 1), (1, 1)),
        dimension_numbers=("NCHW", "OIHW", "NCHW"),
    ) + raw_weights["conv_b"][None, :, None, None]
    ref_act = jnp.maximum(ref_conv, 0.0)
    ref = (bf(ref_act.reshape(N, -1)) @ bf(raw_weights["fc_w"]).T
           + raw_weights["fc_b"])

    assert out.shape == (N, n_cls), out.shape
    assert jnp.allclose(out, ref, atol=5e-3, rtol=5e-3), (
        "mismatch vs reference: max abs diff "
        f"{jnp.max(jnp.abs(out - ref))}")

    print("KERNEL_OK")
</pallas_src>

<mosaic_0001>
module attributes {stable_mosaic.version = 11 : i64} {
  func.func @_fused_conv_gemm_kernel(%arg0: memref<128x512xbf16, #tpu.memory_space<vmem>>, %arg1: memref<128x128xbf16, #tpu.memory_space<vmem>>, %arg2: memref<128x1xf32, #tpu.memory_space<vmem>>, %arg3: memref<8x256x128xbf16, #tpu.memory_space<vmem>>, %arg4: memref<1x128xf32, #tpu.memory_space<vmem>>, %arg5: memref<2x128xf32, #tpu.memory_space<vmem>>, %arg6: memref<128x512xbf16, #tpu.memory_space<vmem>>) attributes {dimension_semantics = [], scalar_prefetch = 0 : i64, scratch_operands = 1 : i64, tpu.core_type = #tpu.core_type<tc>} {
    %c0 = arith.constant 0 : index
    %c0_0 = arith.constant 0 : index
    %0 = vector.load %arg1[%c0, %c0_0] : memref<128x128xbf16, #tpu.memory_space<vmem>>, vector<128x128xbf16>
    %c0_1 = arith.constant 0 : index
    %c0_2 = arith.constant 0 : index
    %1 = vector.load %arg0[%c0_1, %c0_2] : memref<128x512xbf16, #tpu.memory_space<vmem>>, vector<128x256xbf16>
    %cst = arith.constant dense<0.000000e+00> : vector<128x256xf32>
    %2 = tpu.matmul %0, %1, %cst {dimension_numbers = #tpu.dot_dimension_numbers<[1], [0], [0], [1], [0, 0, 1, 1], [], []>} : vector<128x128xbf16>, vector<128x256xbf16>, vector<128x256xf32> -> vector<128x256xf32>
    %c0_3 = arith.constant 0 : index
    %c0_4 = arith.constant 0 : index
    %3 = vector.load %arg2[%c0_3, %c0_4] : memref<128x1xf32, #tpu.memory_space<vmem>>, vector<128x1xf32>
    %4 = vector.broadcast %3 : vector<128x1xf32> to vector<128x256xf32>
    %5 = arith.addf %2, %4 : vector<128x256xf32>
    %cst_5 = arith.constant 0.000000e+00 : f32
    %6 = vector.broadcast %cst_5 : f32 to vector<128x256xf32>
    %7 = arith.maximumf %5, %6 : vector<128x256xf32>
    %8 = arith.truncf %7 : vector<128x256xf32> to vector<128x256xbf16>
    %c0_6 = arith.constant 0 : index
    %c0_7 = arith.constant 0 : index
    %9 = vector.load %arg6[%c0_6, %c0_7] : memref<128x512xbf16, #tpu.memory_space<vmem>>, vector<128x256xbf16>
    tpu.vector_store %arg6[%c0_6, %c0_7], %8 {strides = array<i32>} : memref<128x512xbf16, #tpu.memory_space<vmem>>, vector<128x256xbf16>,
    %c0_8 = arith.constant 0 : index
    %c0_9 = arith.constant 0 : index
    %10 = vector.load %arg1[%c0_8, %c0_9] : memref<128x128xbf16, #tpu.memory_space<vmem>>, vector<128x128xbf16>
    %c0_10 = arith.constant 0 : index
    %c256 = arith.constant 256 : index
    %11 = vector.load %arg0[%c0_10, %c256] : memref<128x512xbf16, #tpu.memory_space<vmem>>, vector<128x256xbf16>
    %cst_11 = arith.constant dense<0.000000e+00> : vector<128x256xf32>
    %12 = tpu.matmul %10, %11, %cst_11 {dimension_numbers = #tpu.dot_dimension_numbers<[1], [0], [0], [1], [0, 0, 1, 1], [], []>} : vector<128x128xbf16>, vector<128x256xbf16>, vector<128x256xf32> -> vector<128x256xf32>
    %c0_12 = arith.constant 0 : index
    %c0_13 = arith.constant 0 : index
    %13 = vector.load %arg2[%c0_12, %c0_13] : memref<128x1xf32, #tpu.memory_space<vmem>>, vector<128x1xf32>
    %14 = vector.broadcast %13 : vector<128x1xf32> to vector<128x256xf32>
    %15 = arith.addf %12, %14 : vector<128x256xf32>
    %cst_14 = arith.constant 0.000000e+00 : f32
    %16 = vector.broadcast %cst_14 : f32 to vector<128x256xf32>
    %17 = arith.maximumf %15, %16 : vector<128x256xf32>
    %18 = arith.truncf %17 : vector<128x256xf32> to vector<128x256xbf16>
    %c0_15 = arith.constant 0 : index
    %c256_16 = arith.constant 256 : index
    %19 = vector.load %arg6[%c0_15, %c256_16] : memref<128x512xbf16, #tpu.memory_space<vmem>>, vector<128x256xbf16>
    tpu.vector_store %arg6[%c0_15, %c256_16], %18 {strides = array<i32>} : memref<128x512xbf16, #tpu.memory_space<vmem>>, vector<128x256xbf16>,
    %cst_17 = arith.constant 0.000000e+00 : f32
    %20 = vector.broadcast %cst_17 : f32 to vector<2x128xf32>
    %c0_18 = arith.constant 0 : index
    %c0_19 = arith.constant 0 : index
    %21 = vector.load %arg6[%c0_18, %c0_19] : memref<128x512xbf16, #tpu.memory_space<vmem>>, vector<1x256xbf16>
    %c0_20 = arith.constant 0 : index
    %c256_21 = arith.constant 256 : index
    %22 = vector.load %arg6[%c0_20, %c256_21] : memref<128x512xbf16, #tpu.memory_space<vmem>>, vector<1x256xbf16>
    %23 = tpu.concatenate %21, %22 in 0 : vector<1x256xbf16>, vector<1x256xbf16> -> vector<2x256xbf16>
    %c0_22 = arith.constant 0 : index
    %c0_23 = arith.constant 0 : index
    %c0_24 = arith.constant 0 : index
    %24 = vector.load %arg3[%c0_22, %c0_23, %c0_24] : memref<8x256x128xbf16, #tpu.memory_space<vmem>>, vector<1x256x128xbf16>
    %25 = vector.shape_cast %24 : vector<1x256x128xbf16> to vector<256x128xbf16>
    %cst_25 = arith.constant dense<0.000000e+00> : vector<2x128xf32>
    %26 = tpu.matmul %23, %25, %cst_25 {dimension_numbers = #tpu.dot_dimension_numbers<[1], [0], [0], [1], [0, 0, 1, 1], [], []>} : vector<2x256xbf16>, vector<256x128xbf16>, vector<2x128xf32> -> vector<2x128xf32>
    %27 = arith.addf %20, %26 : vector<2x128xf32>
    %c1 = arith.constant 1 : index
    %c0_26 = arith.constant 0 : index
    %28 = vector.load %arg6[%c1, %c0_26] : memref<128x512xbf16, #tpu.memory_space<vmem>>, vector<1x256xbf16>
    %c1_27 = arith.constant 1 : index
    %c256_28 = arith.constant 256 : index
    %29 = vector.load %arg6[%c1_27, %c256_28] : memref<128x512xbf16, #tpu.memory_space<vmem>>, vector<1x256xbf16>
    %30 = tpu.concatenate %28, %29 in 0 : vector<1x256xbf16>, vector<1x256xbf16> -> vector<2x256xbf16>
    %c1_29 = arith.constant 1 : index
    %c0_30 = arith.constant 0 : index
    %c0_31 = arith.constant 0 : index
    %31 = vector.load %arg3[%c1_29, %c0_30, %c0_31] : memref<8x256x128xbf16, #tpu.memory_space<vmem>>, vector<1x256x128xbf16>
    %32 = vector.shape_cast %31 : vector<1x256x128xbf16> to vector<256x128xbf16>
    %cst_32 = arith.constant dense<0.000000e+00> : vector<2x128xf32>
    %33 = tpu.matmul %30, %32, %cst_32 {dimension_numbers = #tpu.dot_dimension_numbers<[1], [0], [0], [1], [0, 0, 1, 1], [], []>} : vector<2x256xbf16>, vector<256x128xbf16>, vector<2x128xf32> -> vector<2x128xf32>
    %34 = arith.addf %27, %33 : vector<2x128xf32>
    %c2 = arith.constant 2 : index
    %c0_33 = arith.constant 0 : index
    %35 = vector.load %arg6[%c2, %c0_33] : memref<128x512xbf16, #tpu.memory_space<vmem>>, vector<1x256xbf16>
    %c2_34 = arith.constant 2 : index
    %c256_35 = arith.constant 256 : index
    %36 = vector.load %arg6[%c2_34, %c256_35] : memref<128x512xbf16, #tpu.memory_space<vmem>>, vector<1x256xbf16>
    %37 = tpu.concatenate %35, %36 in 0 : vector<1x256xbf16>, vector<1x256xbf16> -> vector<2x256xbf16>
    %c2_36 = arith.constant 2 : index
    %c0_37 = arith.constant 0 : index
    %c0_38 = arith.constant 0 : index
    %38 = vector.load %arg3[%c2_36, %c0_37, %c0_38] : memref<8x256x128xbf16, #tpu.memory_space<vmem>>, vector<1x256x128xbf16>
    %39 = vector.shape_cast %38 : vector<1x256x128xbf16> to vector<256x128xbf16>
    %cst_39 = arith.constant dense<0.000000e+00> : vector<2x128xf32>
    %40 = tpu.matmul %37, %39, %cst_39 {dimension_numbers = #tpu.dot_dimension_numbers<[1], [0], [0], [1], [0, 0, 1, 1], [], []>} : vector<2x256xbf16>, vector<256x128xbf16>, vector<2x128xf32> -> vector<2x128xf32>
    %41 = arith.addf %34, %40 : vector<2x128xf32>
    %c3 = arith.constant 3 : index
    %c0_40 = arith.constant 0 : index
    %42 = vector.load %arg6[%c3, %c0_40] : memref<128x512xbf16, #tpu.memory_space<vmem>>, vector<1x256xbf16>
    %c3_41 = arith.constant 3 : index
    %c256_42 = arith.constant 256 : index
    %43 = vector.load %arg6[%c3_41, %c256_42] : memref<128x512xbf16, #tpu.memory_space<vmem>>, vector<1x256xbf16>
    %44 = tpu.concatenate %42, %43 in 0 : vector<1x256xbf16>, vector<1x256xbf16> -> vector<2x256xbf16>
    %c3_43 = arith.constant 3 : index
    %c0_44 = arith.constant 0 : index
    %c0_45 = arith.constant 0 : index
    %45 = vector.load %arg3[%c3_43, %c0_44, %c0_45] : memref<8x256x128xbf16, #tpu.memory_space<vmem>>, vector<1x256x128xbf16>
    %46 = vector.shape_cast %45 : vector<1x256x128xbf16> to vector<256x128xbf16>
    %cst_46 = arith.constant dense<0.000000e+00> : vector<2x128xf32>
    %47 = tpu.matmul %44, %46, %cst_46 {dimension_numbers = #tpu.dot_dimension_numbers<[1], [0], [0], [1], [0, 0, 1, 1], [], []>} : vector<2x256xbf16>, vector<256x128xbf16>, vector<2x128xf32> -> vector<2x128xf32>
    %48 = arith.addf %41, %47 : vector<2x128xf32>
    %c4 = arith.constant 4 : index
    %c0_47 = arith.constant 0 : index
    %49 = vector.load %arg6[%c4, %c0_47] : memref<128x512xbf16, #tpu.memory_space<vmem>>, vector<1x256xbf16>
    %c4_48 = arith.constant 4 : index
    %c256_49 = arith.constant 256 : index
    %50 = vector.load %arg6[%c4_48, %c256_49] : memref<128x512xbf16, #tpu.memory_space<vmem>>, vector<1x256xbf16>
    %51 = tpu.concatenate %49, %50 in 0 : vector<1x256xbf16>, vector<1x256xbf16> -> vector<2x256xbf16>
    %c4_50 = arith.constant 4 : index
    %c0_51 = arith.constant 0 : index
    %c0_52 = arith.constant 0 : index
    %52 = vector.load %arg3[%c4_50, %c0_51, %c0_52] : memref<8x256x128xbf16, #tpu.memory_space<vmem>>, vector<1x256x128xbf16>
    %53 = vector.shape_cast %52 : vector<1x256x128xbf16> to vector<256x128xbf16>
    %cst_53 = arith.constant dense<0.000000e+00> : vector<2x128xf32>
    %54 = tpu.matmul %51, %53, %cst_53 {dimension_numbers = #tpu.dot_dimension_numbers<[1], [0], [0], [1], [0, 0, 1, 1], [], []>} : vector<2x256xbf16>, vector<256x128xbf16>, vector<2x128xf32> -> vector<2x128xf32>
    %55 = arith.addf %48, %54 : vector<2x128xf32>
    %c5 = arith.constant 5 : index
    %c0_54 = arith.constant 0 : index
    %56 = vector.load %arg6[%c5, %c0_54] : memref<128x512xbf16, #tpu.memory_space<vmem>>, vector<1x256xbf16>
    %c5_55 = arith.constant 5 : index
    %c256_56 = arith.constant 256 : index
    %57 = vector.load %arg6[%c5_55, %c256_56] : memref<128x512xbf16, #tpu.memory_space<vmem>>, vector<1x256xbf16>
    %58 = tpu.concatenate %56, %57 in 0 : vector<1x256xbf16>, vector<1x256xbf16> -> vector<2x256xbf16>
    %c5_57 = arith.constant 5 : index
    %c0_58 = arith.constant 0 : index
    %c0_59 = arith.constant 0 : index
    %59 = vector.load %arg3[%c5_57, %c0_58, %c0_59] : memref<8x256x128xbf16, #tpu.memory_space<vmem>>, vector<1x256x128xbf16>
    %60 = vector.shape_cast %59 : vector<1x256x128xbf16> to vector<256x128xbf16>
    %cst_60 = arith.constant dense<0.000000e+00> : vector<2x128xf32>
    %61 = tpu.matmul %58, %60, %cst_60 {dimension_numbers = #tpu.dot_dimension_numbers<[1], [0], [0], [1], [0, 0, 1, 1], [], []>} : vector<2x256xbf16>, vector<256x128xbf16>, vector<2x128xf32> -> vector<2x128xf32>
    %62 = arith.addf %55, %61 : vector<2x128xf32>
    %c6 = arith.constant 6 : index
    %c0_61 = arith.constant 0 : index
    %63 = vector.load %arg6[%c6, %c0_61] : memref<128x512xbf16, #tpu.memory_space<vmem>>, vector<1x256xbf16>
    %c6_62 = arith.constant 6 : index
    %c256_63 = arith.constant 256 : index
    %64 = vector.load %arg6[%c6_62, %c256_63] : memref<128x512xbf16, #tpu.memory_space<vmem>>, vector<1x256xbf16>
    %65 = tpu.concatenate %63, %64 in 0 : vector<1x256xbf16>, vector<1x256xbf16> -> vector<2x256xbf16>
    %c6_64 = arith.constant 6 : index
    %c0_65 = arith.constant 0 : index
    %c0_66 = arith.constant 0 : index
    %66 = vector.load %arg3[%c6_64, %c0_65, %c0_66] : memref<8x256x128xbf16, #tpu.memory_space<vmem>>, vector<1x256x128xbf16>
    %67 = vector.shape_cast %66 : vector<1x256x128xbf16> to vector<256x128xbf16>
    %cst_67 = arith.constant dense<0.000000e+00> : vector<2x128xf32>
    %68 = tpu.matmul %65, %67, %cst_67 {dimension_numbers = #tpu.dot_dimension_numbers<[1], [0], [0], [1], [0, 0, 1, 1], [], []>} : vector<2x256xbf16>, vector<256x128xbf16>, vector<2x128xf32> -> vector<2x128xf32>
    %69 = arith.addf %62, %68 : vector<2x128xf32>
    %c7 = arith.constant 7 : index
    %c0_68 = arith.constant 0 : index
    %70 = vector.load %arg6[%c7, %c0_68] : memref<128x512xbf16, #tpu.memory_space<vmem>>, vector<1x256xbf16>
    %c7_69 = arith.constant 7 : index
    %c256_70 = arith.constant 256 : index
    %71 = vector.load %arg6[%c7_69, %c256_70] : memref<128x512xbf16, #tpu.memory_space<vmem>>, vector<1x256xbf16>
    %72 = tpu.concatenate %70, %71 in 0 : vector<1x256xbf16>, vector<1x256xbf16> -> vector<2x256xbf16>
    %c7_71 = arith.constant 7 : index
    %c0_72 = arith.constant 0 : index
    %c0_73 = arith.constant 0 : index
    %73 = vector.load %arg3[%c7_71, %c0_72, %c0_73] : memref<8x256x128xbf16, #tpu.memory_space<vmem>>, vector<1x256x128xbf16>
    %74 = vector.shape_cast %73 : vector<1x256x128xbf16> to vector<256x128xbf16>
    %cst_74 = arith.constant dense<0.000000e+00> : vector<2x128xf32>
    %75 = tpu.matmul %72, %74, %cst_74 {dimension_numbers = #tpu.dot_dimension_numbers<[1], [0], [0], [1], [0, 0, 1, 1], [], []>} : vector<2x256xbf16>, vector<256x128xbf16>, vector<2x128xf32> -> vector<2x128xf32>
    %76 = arith.addf %69, %75 : vector<2x128xf32>
    %c0_75 = arith.constant 0 : index
    %c0_76 = arith.constant 0 : index
    %77 = vector.load %arg4[%c0_75, %c0_76] : memref<1x128xf32, #tpu.memory_space<vmem>>, vector<1x128xf32>
    %78 = vector.broadcast %77 : vector<1x128xf32> to vector<2x128xf32>
    %79 = arith.addf %76, %78 : vector<2x128xf32>
    %c0_77 = arith.constant 0 : index
    %c0_78 = arith.constant 0 : index
    %80 = vector.load %arg5[%c0_77, %c0_78] : memref<2x128xf32, #tpu.memory_space<vmem>>, vector<2x128xf32>
    tpu.vector_store %arg5[%c0_77, %c0_78], %79 {strides = array<i32>} : memref<2x128xf32, #tpu.memory_space<vmem>>, vector<2x128xf32>,
    return
  }
}

</mosaic_0001>

<bundles_post_ra>
// kernel: a_call__.1
= control target key start
LH: loop header
LB: loop body
LE: loop exit
PB: predicated region body
PF: predicated region fallthrough
CT: control target
= control target key end

     0   :  { %v3490_v2 = vmov 0   ;;  %s4248_s0 = inlined_call_operand.vmem [shape: bf16[128,512], index: 0, kind: input, shape index: {}]   ;;  %s4249_s1 = inlined_call_operand.vmem [shape: bf16[128,128], index: 1, kind: input, shape index: {}]   ;;  %s4250_s2 = inlined_call_operand.vmem [shape: f32[128,1], index: 2, kind: input, shape index: {}]   ;;  %s4251_s3 = inlined_call_operand.vmem [shape: bf16[8,256,128], index: 3, kind: input, shape index: {}]   ;;  %s4252_s4 = inlined_call_operand.vmem [shape: f32[1,128], index: 4, kind: input, shape index: {}]   ;;  %s4253_s5 = inlined_call_operand.hbm [shape: f32[2,128], index: 5, kind: output, shape index: {}]  }
   0x1   :  { %v3260_v0 = vld [vmem:[%s4248_s0 + $0xe4] ss:$16 sps:$4 sm:$0xff]   ;;  %v3262_v1 = vld [vmem:[%s4248_s0 + $0xec] ss:$16 sps:$4 sm:$0xff]   ;;  %310 = vmatprep.mubr.bf16.mxu0 %v3490_v2  ;;  %823 = vmatprep.mubr.bf16.mxu1 %v3490_v2  ;;  %v3264_v3 = vld [vmem:[%s4248_s0 + $0xe0] ss:$16 sps:$4 sm:$0xff]  }
   0x2   :  { %278 = vmatprep.subr.bf16.mxu0 %v3260_v0  ;;  %v3265_v4 = vld [vmem:[%s4248_s0 + $0xe8] ss:$16 sps:$4 sm:$0xff]   ;;  %3258 = vset.pattern.permute.xlu0 %v3490_v2  ;;  %v3266_v5 = vld [vmem:[%s4248_s0 + $0xc4] ss:$16 sps:$4 sm:$0xff]   ;;  %v3268_v6 = vld [vmem:[%s4248_s0 + $0xcc] ss:$16 sps:$4 sm:$0xff]  }
   0x3   :  { %791 = vmatprep.subr.bf16.mxu1 %v3262_v1  ;;  %3259 = vset.pattern.permute.xlu1 %v3490_v2  ;;  %v3270_v7 = vld [vmem:[%s4248_s0 + $0xc0] ss:$16 sps:$4 sm:$0xff]   ;;  %v3271_v8 = vld [vmem:[%s4248_s0 + $0xc8] ss:$16 sps:$4 sm:$0xff]   ;;  %v3272_v9 = vld [vmem:[%s4248_s0 + $0xa4] ss:$16 sps:$4 sm:$0xff]  }
   0x4   :  { %279 = vmatpush1.bf16.msra.mxu0 %v3264_v3  ;;  %792 = vmatpush1.bf16.msra.mxu1 %v3265_v4  ;;  %v3274_v10 = vld [vmem:[%s4248_s0 + $0xac] ss:$16 sps:$4 sm:$0xff]   ;;  %v3276_v11 = vld [vmem:[%s4248_s0 + $0xa0] ss:$16 sps:$4 sm:$0xff]   ;;  %v3277_v12 = vld [vmem:[%s4248_s0 + $0xa8] ss:$16 sps:$4 sm:$0xff]  }
   0x5   :  { %280 = vmatprep.subr.bf16.mxu0 %v3266_v5  ;;  %793 = vmatprep.subr.bf16.mxu1 %v3268_v6  ;;  %v3278_v13 = vld [vmem:[%s4248_s0 + $0x84] ss:$16 sps:$4 sm:$0xff]   ;;  %v3280_v14 = vld [vmem:[%s4248_s0 + $0x8c] ss:$16 sps:$4 sm:$0xff]   ;;  %v3282_v15 = vld [vmem:[%s4248_s0 + $0x80] ss:$16 sps:$4 sm:$0xff]  }
   0x6   :  { %v3283_v16 = vld [vmem:[%s4248_s0 + $0x88] ss:$16 sps:$4 sm:$0xff]   ;;  %v3284_v17 = vld [vmem:[%s4248_s0 + $0x64] ss:$16 sps:$4 sm:$0xff]   ;;  %v3286_v18 = vld [vmem:[%s4248_s0 + $0x6c] ss:$16 sps:$4 sm:$0xff]  }
   0x7   :  { %v3288_v19 = vld [vmem:[%s4248_s0 + $0x60] ss:$16 sps:$4 sm:$0xff]   ;;  %v3289_v20 = vld [vmem:[%s4248_s0 + $0x68] ss:$16 sps:$4 sm:$0xff]   ;;  %v3290_v21 = vld [vmem:[%s4248_s0 + $0x44] ss:$16 sps:$4 sm:$0xff]  }
   0x8   :  { %281 = vmatpush1.bf16.msra.mxu0 %v3270_v7  ;;  %794 = vmatpush1.bf16.msra.mxu1 %v3271_v8  ;;  %v3292_v22 = vld [vmem:[%s4248_s0 + $0x4c] ss:$16 sps:$4 sm:$0xff]   ;;  %v3294_v23 = vld [vmem:[%s4248_s0 + $0x40] ss:$16 sps:$4 sm:$0xff]   ;;  %v3295_v24 = vld [vmem:[%s4248_s0 + $0x48] ss:$16 sps:$4 sm:$0xff]  }
   0x9   :  { %282 = vmatprep.subr.bf16.mxu0 %v3272_v9  ;;  %795 = vmatprep.subr.bf16.mxu1 %v3274_v10  ;;  %v3296_v25 = vld [vmem:[%s4248_s0 + $0x24] ss:$16 sps:$4 sm:$0xff]   ;;  %v3298_v26 = vld [vmem:[%s4248_s0 + $0x2c] ss:$16 sps:$4 sm:$0xff]   ;;  %v3300_v27 = vld [vmem:[%s4248_s0 + $0x20] ss:$16 sps:$4 sm:$0xff]  }
   0xa   :  { %v3301_v28 = vld [vmem:[%s4248_s0 + $0x28] ss:$16 sps:$4 sm:$0xff]   ;;  %v3302_v29 = vld [vmem:[%s4248_s0 + $0x4] ss:$16 sps:$4 sm:$0xff]   ;;  %v3304_v30 = vld [vmem:[%s4248_s0 + $0xc] ss:$16 sps:$4 sm:$0xff]  }
   0xb   :  { %v54_v31 = vld [vmem:[%s4250_s2] sm:$0xff]  ;;  %v3307_v33 = vld [vmem:[%s4248_s0 + $0x8] ss:$16 sps:$4 sm:$0xff]   ;;  %v3657_v41 = vld [vmem:[%s4250_s2 + $0x10] sm:$0xff] }
   0xc   :  { %283 = vmatpush1.bf16.msra.mxu0 %v3276_v11  ;;  %796 = vmatpush1.bf16.msra.mxu1 %v3277_v12  ;;  %v3306_v32 = vld [vmem:[%s4248_s0] ss:$16 sps:$4 sm:$0xff]   ;;  %v3634_v36 = vld [vmem:[%s4250_s2 + $0x18] sm:$0xff]  ;;  %v59_v37 = vld [vmem:[%s4250_s2 + $0x28] sm:$0xff] }
   0xd   :  { %284 = vmatprep.subr.bf16.mxu0 %v3278_v13  ;;  %797 = vmatprep.subr.bf16.mxu1 %v3280_v14  ;;  %v3308_v34 = vld [vmem:[%s4249_s1] sm:$0xff]   ;;  %v3643_v38 = vld [vmem:[%s4250_s2 + $0x8] sm:$0xff]  ;;  %v61_v42 = vld [vmem:[%s4250_s2 + $0x38] sm:$0xff] }
   0xe   :  { %72 = vperm.xlu0 %3258, %v54_v31   ;;  %v3309_v35 = vld [vmem:[%s4249_s1] sm:$0xff]   ;;  %v3310_v39 = vld [vmem:[%s4249_s1 + $0x8] sm:$0xff]   ;;  %77 = vperm.xlu1 %3259, %v3643_v38   ;;  %v3324_v45 = vld [vmem:[%s4251_s3 + $0xf8] sm:$0xff]  }
   0xf   :  { %v3311_v40 = vld [vmem:[%s4249_s1 + $0x8] sm:$0xff]   ;;  %v3669_v44 = vld [vmem:[%s4250_s2 + $0x20] sm:$0xff]  ;;  %v3679_v46 = vld [vmem:[%s4250_s2 + $0x30] sm:$0xff] }
  0x10   :  { %285 = vmatpush1.bf16.msra.mxu0 %v3282_v15  ;;  %798 = vmatpush1.bf16.msra.mxu1 %v3283_v16  ;;  %v63_v43 = vld [vmem:[%s4250_s2 + $0x48] sm:$0xff]  ;;  %v3325_v47 = vld [vmem:[%s4251_s3 + $0xb8] sm:$0xff]   ;;  %v3312_v48 = vld [vmem:[%s4249_s1 + $0x10] sm:$0xff]  }
  0x11   :  { %286 = vmatprep.subr.bf16.mxu0 %v3284_v17  ;;  %799 = vmatprep.subr.bf16.mxu1 %v3286_v18  ;;  %v3313_v49 = vld [vmem:[%s4249_s1 + $0x10] sm:$0xff]   ;;  %v65_v50 = vld [vmem:[%s4250_s2 + $0x58] sm:$0xff]  ;;  %v3706_v54 = vld [vmem:[%s4250_s2 + $0x40] sm:$0xff] }
  0x12   :  { %585 = vperm.xlu0 %3258, %v54_v31   ;;  %82 = vperm.xlu1 %3259, %v3657_v41   ;;  %v3326_v51 = vld [vmem:[%s4251_s3 + $0x78] sm:$0xff]   ;;  %v3328_v53 = vld [vmem:[%s4251_s3 + $0xf0] sm:$0xff]   ;;  %v67_v56 = vld [vmem:[%s4250_s2 + $0x68] sm:$0xff] }
  0x13   :  { %v3327_v52 = vld [vmem:[%s4251_s3 + $0x38] sm:$0xff]   ;;  %v3329_v55 = vld [vmem:[%s4251_s3 + $0xb0] sm:$0xff]   ;;  %v3332_v63 = vld [vmem:[%s4251_s3 + $0xe8] sm:$0xff]  }
  0x14   :  { %287 = vmatpush1.bf16.msra.mxu0 %v3288_v19  ;;  %800 = vmatpush1.bf16.msra.mxu1 %v3289_v20  ;;  %v3330_v57 = vld [vmem:[%s4251_s3 + $0x70] sm:$0xff]   ;;  %v3314_v60 = vld [vmem:[%s4249_s1 + $0x18] sm:$0xff]   ;;  %v3333_v0 = vld [vmem:[%s4251_s3 + $0xa8] sm:$0xff]  }
  0x15   :  { %288 = vmatprep.subr.bf16.mxu0 %v3290_v21  ;;  %801 = vmatprep.subr.bf16.mxu1 %v3292_v22  ;;  %v3331_v58 = vld [vmem:[%s4251_s3 + $0x30] sm:$0xff]   ;;  %v3315_v61 = vld [vmem:[%s4249_s1 + $0x18] sm:$0xff]   ;;  %v3334_v1 = vld [vmem:[%s4251_s3 + $0x68] sm:$0xff]  }
  0x16   :  { %87 = vperm.xlu0 %3258, %v3634_v36   ;;  %92 = vperm.xlu1 %3259, %v3669_v44   ;;  %v3726_v59 = vld [vmem:[%s4250_s2 + $0x50] sm:$0xff]  ;;  %v69_v62 = vld [vmem:[%s4250_s2 + $0x78] sm:$0xff]  ;;  %v66_v3 = vld [vmem:[%s4250_s2 + $0x60] sm:$0xff] }
  0x17   :  { %v3335_v4 = vld [vmem:[%s4251_s3 + $0x28] sm:$0xff]   ;;  %v68_v5 = vld [vmem:[%s4250_s2 + $0x70] sm:$0xff]  ;;  %v3316_v6 = vld [vmem:[%s4249_s1 + $0x20] sm:$0xff]  }
  0x18   :  { %289 = vmatpush1.bf16.msra.mxu0 %v3294_v23  ;;  %802 = vmatpush1.bf16.msra.mxu1 %v3295_v24  ;;  %v3317_v7 = vld [vmem:[%s4249_s1 + $0x20] sm:$0xff]   ;;  %v3318_v12 = vld [vmem:[%s4249_s1 + $0x28] sm:$0xff]   ;;  %v3340_v14 = vld [vmem:[%s4251_s3 + $0xd8] sm:$0xff]  }
  0x19   :  { %290 = vmatprep.subr.bf16.mxu0 %v3296_v25  ;;  %803 = vmatprep.subr.bf16.mxu1 %v3298_v26  ;;  %v3336_v8 = vld [vmem:[%s4251_s3 + $0xe0] sm:$0xff]   ;;  %v3319_v13 = vld [vmem:[%s4249_s1 + $0x28] sm:$0xff]   ;;  %v3341_v15 = vld [vmem:[%s4251_s3 + $0x98] sm:$0xff]  }
  0x1a   :  { %97 = vperm.xlu0 %3258, %v59_v37   ;;  %102 = vperm.xlu1 %3259, %v3679_v46   ;;  %v3337_v9 = vld [vmem:[%s4251_s3 + $0xa0] sm:$0xff]   ;;  %v3342_v16 = vld [vmem:[%s4251_s3 + $0x58] sm:$0xff]   ;;  %v3320_v18 = vld [vmem:[%s4249_s1 + $0x30] sm:$0xff]  }
  0x1b   :  { %v3338_v10 = vld [vmem:[%s4251_s3 + $0x60] sm:$0xff]   ;;  %v3343_v17 = vld [vmem:[%s4251_s3 + $0x18] sm:$0xff]   ;;  %v3321_v19 = vld [vmem:[%s4249_s1 + $0x30] sm:$0xff]  }
  0x1c   :  { %291 = vmatpush1.bf16.msra.mxu0 %v3300_v27  ;;  %804 = vmatpush1.bf16.msra.mxu1 %v3301_v28  ;;  %v3339_v11 = vld [vmem:[%s4251_s3 + $0x20] sm:$0xff]   ;;  %v3344_v20 = vld [vmem:[%s4251_s3 + $0xd0] sm:$0xff]   ;;  %v3322_v22 = vld [vmem:[%s4249_s1 + $0x38] sm:$0xff]  }
  0x1d   :  { %292 = vmatprep.subr.bf16.mxu0 %v3302_v29  ;;  %805 = vmatprep.subr.bf16.mxu1 %v3304_v30  ;;  %v3345_v21 = vld [vmem:[%s4251_s3 + $0x90] sm:$0xff]   ;;  %v3323_v23 = vld [vmem:[%s4249_s1 + $0x38] sm:$0xff]   ;;  %v3350_v26 = vld [vmem:[%s4251_s3 + $0x48] sm:$0xff]  }
  0x1e   :  { %107 = vperm.xlu0 %3258, %v61_v42   ;;  %112 = vperm.xlu1 %3259, %v3706_v54   ;;  %v3346_v24 = vld [vmem:[%s4251_s3 + $0x50] sm:$0xff]   ;;  %v3349_v27 = vld [vmem:[%s4251_s3 + $0x88] sm:$0xff]   ;;  %v3352_v29 = vld [vmem:[%s4251_s3 + $0xc0] sm:$0xff]  }
  0x1f   :  { %v3347_v25 = vld [vmem:[%s4251_s3 + $0x10] sm:$0xff]   ;;  %v3351_v28 = vld [vmem:[%s4251_s3 + $0x8] sm:$0xff]   ;;  %v3354_v30 = vld [vmem:[%s4251_s3 + $0x40] sm:$0xff]  }
  0x20   :  { %293 = vmatpush1.bf16.msra.mxu0 %v3306_v32  ;;  %806 = vmatpush1.bf16.msra.mxu1 %v3307_v33  ;;  %v3353_v31 = vld [vmem:[%s4251_s3 + $0x80] sm:$0xff]   ;;  %v3360_v33 = vld [vmem:[%s4251_s3 + $0x178] sm:$0xff]  }
  0x21   :  { %3080 = vmatprep.subr.bf16.mxu0 %v3324_v45  ;;  %3102 = vmatprep.subr.bf16.mxu1 %v3326_v51  ;;  %v3355_v32 = vld [vmem:[%s4251_s3] sm:$0xff]  }
  0x22   :  { %117 = vperm.xlu0 %3258, %v63_v43   ;;  %122 = vperm.xlu1 %3259, %v3726_v59  }
  0x23   :  { %311 = vmatmul.mubr.bf16.vlgmr.msra.gmra.mxu0 %v3308_v34  ;;  %824 = vmatmul.mubr.bf16.vlgmr.msra.gmra.mxu1 %v3309_v35  ;;  %v3361_v34 = vld [vmem:[%s4251_s3 + $0x1f8] sm:$0xff]  }
  0x24   :  { %320 = vmatprep.mubr.bf16.mxu0 %v3490_v2  ;;  %833 = vmatprep.mubr.bf16.mxu1 %v3490_v2 }
  0x25   :  { %3081 = vmatpush3.bf16.msra.mxu0 %v3325_v47  ;;  %3103 = vmatpush3.bf16.msra.mxu1 %v3327_v52 }
  0x26   :  { %3082 = vmatprep.subr.bf16.mxu0 %v3328_v53  ;;  %127 = vperm.xlu0 %3258, %v65_v50  }
  0x27   :  { %3104 = vmatprep.subr.bf16.mxu1 %v3330_v57  ;;  %132 = vperm.xlu1 %3259, %v66_v3  }
  0x29   :  { %3083 = vmatpush3.bf16.msra.mxu0 %v3329_v55  ;;  %3105 = vmatpush3.bf16.msra.mxu1 %v3331_v58 }
  0x2a   :  { %137 = vperm.xlu0 %3258, %v67_v56   ;;  %3084 = vmatprep.subr.bf16.mxu0 %v3332_v63 }
  0x2b   :  { %321 = vmatmul.mubr.bf16.gmra.mxu0 %v3310_v39  ;;  %834 = vmatmul.mubr.bf16.gmra.mxu1 %v3311_v40 }
  0x2c   :  { %330 = vmatprep.mubr.bf16.mxu0 %v3490_v2  ;;  %843 = vmatprep.mubr.bf16.mxu1 %v3490_v2 }
  0x2d   :  { %3106 = vmatprep.subr.bf16.mxu1 %v3334_v1  ;;  %3085 = vmatpush3.bf16.msra.mxu0 %v3333_v0 }
  0x2e   :  { %147 = vperm.xlu0 %3258, %v69_v62   ;;  %3107 = vmatpush3.bf16.msra.mxu1 %v3335_v4 }
  0x2f   :  { %3086 = vmatprep.subr.bf16.mxu0 %v3336_v8  ;;  %3108 = vmatprep.subr.bf16.mxu1 %v3338_v10 }
  0x30   :  { %142 = vperm.xlu1 %3259, %v68_v5  }
  0x31   :  { %3087 = vmatpush3.bf16.msra.mxu0 %v3337_v9 }
  0x32   :  { %595 = vperm.xlu0 %3258, %v3657_v41   ;;  %3109 = vmatpush3.bf16.msra.mxu1 %v3339_v11 }
  0x33   :  { %331 = vmatmul.mubr.bf16.gmra.mxu0 %v3312_v48  ;;  %844 = vmatmul.mubr.bf16.gmra.mxu1 %v3313_v49 }
  0x34   :  { %340 = vmatprep.mubr.bf16.mxu0 %v3490_v2  ;;  %853 = vmatprep.mubr.bf16.mxu1 %v3490_v2 }
  0x35   :  { %590 = vperm.xlu1 %3259, %v3643_v38   ;;  %3088 = vmatprep.subr.bf16.mxu0 %v3340_v14 }
  0x36   :  { %605 = vperm.xlu0 %3258, %v3669_v44   ;;  %3110 = vmatprep.subr.bf16.mxu1 %v3342_v16 }
  0x37   :  { %3089 = vmatpush3.bf16.msra.mxu0 %v3341_v15  ;;  %3111 = vmatpush3.bf16.msra.mxu1 %v3343_v17 }
  0x38   :  { %3090 = vmatprep.subr.bf16.mxu0 %v3344_v20  ;;  %3112 = vmatprep.subr.bf16.mxu1 %v3346_v24 }
  0x39   :  { %600 = vperm.xlu1 %3259, %v3634_v36  }
  0x3a   :  { %615 = vperm.xlu0 %3258, %v3679_v46  }
  0x3b   :  { %341 = vmatmul.mubr.bf16.gmra.mxu0 %v3314_v60  ;;  %854 = vmatmul.mubr.bf16.gmra.mxu1 %v3315_v61 }
  0x3c   :  { %350 = vmatprep.mubr.bf16.mxu0 %v3490_v2  ;;  %863 = vmatprep.mubr.bf16.mxu1 %v3490_v2 }
  0x3d   :  { %3091 = vmatpush3.bf16.msra.mxu0 %v3345_v21  ;;  %3113 = vmatpush3.bf16.msra.mxu1 %v3347_v25 }
  0x3e   :  { %625 = vperm.xlu0 %3258, %v3706_v54   ;;  %3114 = vmatprep.subr.bf16.mxu1 %v3350_v26 }
  0x41   :  { %3115 = vmatpush3.bf16.msra.mxu1 %v3351_v28 }
  0x42   :  { %635 = vperm.xlu0 %3258, %v3726_v59   ;;  %3116 = vmatprep.subr.bf16.mxu1 %v3354_v30 }
  0x43   :  { %351 = vmatmul.mubr.bf16.gmra.mxu0 %v3316_v6  ;;  %864 = vmatmul.mubr.bf16.gmra.mxu1 %v3317_v7 }
  0x44   :  { %360 = vmatprep.mubr.bf16.mxu0 %v3490_v2  ;;  %873 = vmatprep.mubr.bf16.mxu1 %v3490_v2 }
  0x45   :  { %3117 = vmatpush3.bf16.msra.mxu1 %v3355_v32 }
  0x46   :  { %645 = vperm.xlu0 %3258, %v66_v3   ;;  %3146 = vmatprep.subr.bf16.mxu1 %v3361_v34 }
  0x4a   :  { %655 = vperm.xlu0 %3258, %v68_v5  }
  0x4b   :  { %361 = vmatmul.mubr.bf16.gmra.mxu0 %v3318_v12  ;;  %874 = vmatmul.mubr.bf16.gmra.mxu1 %v3319_v13 }
  0x4c   :  { %370 = vmatprep.mubr.bf16.mxu0 %v3490_v2  ;;  %883 = vmatprep.mubr.bf16.mxu1 %v3490_v2 }
  0x53   :  { %371 = vmatmul.mubr.bf16.gmra.mxu0 %v3320_v18  ;;  %884 = vmatmul.mubr.bf16.gmra.mxu1 %v3321_v19 }
  0x54   :  { %380 = vmatprep.mubr.bf16.mxu0 %v3490_v2  ;;  %893 = vmatprep.mubr.bf16.mxu1 %v3490_v2  ;;  %v3348_v2 = vld [vmem:[%s4251_s3 + $0xc8] sm:$0xff]  }
  0x55   :  { %3092 = vmatprep.subr.bf16.mxu0 %v3348_v2 }
  0x56   :  { %3093 = vmatpush3.bf16.msra.mxu0 %v3349_v27 }
  0x57   :  { %3094 = vmatprep.subr.bf16.mxu0 %v3352_v29 }
  0x5a   :  { %3095 = vmatpush3.bf16.msra.mxu0 %v3353_v31 }
  0x5b   :  { %381 = vmatmul.mubr.bf16.gmra.mxu0 %v3322_v22  ;;  %894 = vmatmul.mubr.bf16.gmra.mxu1 %v3323_v23 }
  0x5c   :  { %3124 = vmatprep.subr.bf16.mxu0 %v3360_v33 }
  0x5d   :  { %10 = vsyncpa [#allocation4], 0  ;;  %v572_v35 = vld [vmem:[%s4250_s2 + $0x28] sm:$0xff]  ;;  %v574_v36 = vld [vmem:[%s4250_s2 + $0x38] sm:$0xff]  ;;  %vm1070_vm0 = vcmask 1040384   ;;  %s3491_s13 = smov [#allocation3]  }
  0x5e   :  { %610 = vperm.xlu1 %3259, %v572_v35   ;;  %v576_v37 = vld [vmem:[%s4250_s2 + $0x48] sm:$0xff]  ;;  %v578_v38 = vld [vmem:[%s4250_s2 + $0x58] sm:$0xff]  ;;  %vm1071_vm1 = vsmask.f32 256  ;;  %s2591_s14 = sshll.u32 %s3491_s13, 4  ;;  %s2592_s14 = int_to_ptr.vmem [resolvable:$true] %s2591_s14 }
  0x5f   :  { %v580_v39 = vld [vmem:[%s4250_s2 + $0x68] sm:$0xff]  ;;  %v582_v42 = vld [vmem:[%s4250_s2 + $0x78] sm:$0xff]  ;;  %vm3882_vm2 = vmand %vm1070_vm0, %vm1071_vm1  ;;  %s3468_s0 = scalar_lea.vmem %s2592_s14, 32  ;;  %p3473_p1 = scmp.lt.s32.totalorder %s2592_s14, %s2592_s14 }
  0x60   :  { %p3469_p0 = scmp.ne.s32.totalorder %s2592_s14, %s3468_s0  ;;  %p3474_p2 = scmp.lt.s32.totalorder %s3468_s0, %s3468_s0 }
  0x62   :  { %620 = vperm.xlu1 %3259, %v574_v36   ;;  %p3475_p3 = por %p3474_p2, %p3473_p1 }
  0x64   :  { %p3476_p4 = pnand %p3475_p3, %p3469_p0 }
  0x66   :  { %630 = vperm.xlu1 %3259, %v576_v37  }
  0x6a   :  { %640 = vperm.xlu1 %3259, %v578_v38  }
  0x6e   :  { %650 = vperm.xlu1 %3259, %v580_v39  }
  0x72   :  { %660 = vperm.xlu1 %3259, %v582_v42  }
  0x89   :  { %v73_v40 = vpop.permute.xlu0 %72  ;;  %v78_v41 = vpop.permute.xlu1 %77 }
  0x8a   :  { %v3362_v41 = vld [vmem:[%s4251_s3 + $0x138] sm:$0xff]  }
  0x8d   :  { %v586_v43 = vpop.permute.xlu0 %585  ;;  %v83_v44 = vpop.permute.xlu1 %82 }
  0x91   :  { %v88_v45 = vpop.permute.xlu0 %87  ;;  %v93_v46 = vpop.permute.xlu1 %92 }
  0x95   :  { %v98_v47 = vpop.permute.xlu0 %97  ;;  %v103_v48 = vpop.permute.xlu1 %102 }
  0x99   :  { %v108_v49 = vpop.permute.xlu0 %107  ;;  %v113_v50 = vpop.permute.xlu1 %112 }
  0x9a   :  { %v3366_v50 = vld [vmem:[%s4251_s3 + $0x170] sm:$0xff]  }
  0x9d   :  { %v118_v51 = vpop.permute.xlu0 %117  ;;  %v123_v52 = vpop.permute.xlu1 %122 }
  0x9e   :  { %v3367_v51 = vld [vmem:[%s4251_s3 + $0x1f0] sm:$0xff]  }
  0xa1   :  { %v128_v53 = vpop.permute.xlu0 %127 }
  0xa2   :  { %v133_v54 = vpop.permute.xlu1 %132 }
  0xa5   :  { %v138_v55 = vpop.permute.xlu0 %137 }
  0xa9   :  { %v148_v59 = vpop.permute.xlu0 %147 }
  0xab   :  { %v143_v56 = vpop.permute.xlu1 %142 }
  0xad   :  { %v596_v12 = vpop.permute.xlu0 %595 }
  0xb0   :  { %v591_v3 = vpop.permute.xlu1 %590 }
  0xb1   :  { %v606_v23 = vpop.permute.xlu0 %605  ;;  %v3371_v3 = vld [vmem:[%s4251_s3 + $0x1e8] sm:$0xff]  }
  0xb2   :  { %v3378_v23 = vld [vmem:[%s4251_s3 + $0x158] sm:$0xff]  }
  0xe3   :  { %v825_v57 = vpop.f32.mrf.mxu1  ;;  %v312_v58 = vpop.f32.mrf.mxu0 }
  0xe4   :  { %v826_v60 = vadd.f32 %v825_v57, %v586_v43  ;;  %v313_v61 = vadd.f32 %v312_v58, %v73_v40  ;;  %v616_v57 = vpop.permute.xlu0 %615  ;;  %v3368_v58 = vld [vmem:[%s4251_s3 + $0x130] sm:$0xff]  }
  0xe5   :  { %v314_v62 = vpop.f32.mrf.mxu0  ;;  %v827_v63 = vpop.f32.mrf.mxu1  ;;  %v3390_v57 = vld [vmem:[%s4251_s3 + $0x140] sm:$0xff]  }
  0xe6   :  { %v315_v0 = vadd.f32 %v314_v62, %v73_v40  ;;  %v828_v1 = vadd.f32 %v827_v63, %v586_v43  ;;  %v904_v6 = vmax.f32 %v826_v60, 0.0  ;;  %v391_v7 = vmax.f32 %v313_v61, 0.0  ;;  %v3363_v43 = vld [vmem:[%s4251_s3 + $0x1b8] sm:$0xff]  }
  0xe7   :  { %v829_v4 = vpop.f32.mrf.mxu1  ;;  %v316_v5 = vpop.f32.mrf.mxu0 }
  0xe8   :  { %v392_v8 = vmax.f32 %v315_v0, 0.0  ;;  %v905_v9 = vmax.f32 %v828_v1, 0.0  ;;  %v3369_v0 = vld [vmem:[%s4251_s3 + $0x1b0] sm:$0xff]   ;;  %v3370_v1 = vld [vmem:[%s4251_s3 + $0x168] sm:$0xff]  }
  0xe9   :  { %v318_v10 = vpop.f32.mrf.mxu0  ;;  %v831_v11 = vpop.f32.mrf.mxu1 }
  0xea   :  { %v3048_v13 = vpack.c.bf16 %v392_v8, %v391_v7  ;;  %v3064_v14 = vpack.c.bf16 %v905_v9, %v904_v6  ;;  %v3372_v9 = vld [vmem:[%s4251_s3 + $0x128] sm:$0xff]  }
  0xeb   :  { %v322_v15 = vpop.f32.mrf.mxu0  ;;  %v835_v16 = vpop.f32.mrf.mxu1 }
  0xec   :  { %519 = vst [vmem:[#allocation2 + $0x68] sm:$0xff] %v3048_v13  ;;  %1032 = vst [vmem:[#allocation2 + $0x70] sm:$0xff] %v3064_v14  ;;  %v3373_v13 = vld [vmem:[%s4251_s3 + $0x1a8] sm:$0xff]   ;;  %v3374_v14 = vld [vmem:[%s4251_s3 + $0x160] sm:$0xff]  }
  0xed   :  { %v324_v17 = vpop.f32.mrf.mxu0  ;;  %v837_v18 = vpop.f32.mrf.mxu1  ;;  %v3375_v15 = vld [vmem:[%s4251_s3 + $0x1e0] sm:$0xff]  }
  0xee   :  { %v626_v18 = vpop.permute.xlu0 %625 }
  0xef   :  { %v326_v19 = vpop.f32.mrf.mxu0  ;;  %v839_v20 = vpop.f32.mrf.mxu1 }
  0xf0   :  { %v3376_v19 = vld [vmem:[%s4251_s3 + $0x120] sm:$0xff]  }
  0xf1   :  { %v328_v21 = vpop.f32.mrf.mxu0  ;;  %v841_v22 = vpop.f32.mrf.mxu1 }
  0xf2   :  { %v3377_v22 = vld [vmem:[%s4251_s3 + $0x1a0] sm:$0xff]  }
  0xf3   :  { %v332_v24 = vpop.f32.mrf.mxu0  ;;  %v845_v25 = vpop.f32.mrf.mxu1  ;;  %v1048_v2 = vld [vmem:[#allocation2 + $0x68] sm:$0x11]  ;;  %v1049_v26 = vld [vmem:[#allocation2 + $0x70] sm:$0x11]  ;;  %v3880_v27 = vld [vmem:[#allocation2 + $0x68] sm:$0x22] }
  0xf4   :  { %v2679_v28 = vcombine.low %v1048_v2, %v1048_v2  ;;  %v2680_v31 = vcombine.high %v1048_v2, %v1048_v2  ;;  %v2681_v32 = vcombine.low %v1049_v26, %v1049_v26  ;;  %v2682_v33 = vcombine.high %v1049_v26, %v1049_v26  ;;  %v3894_v44 = vld [vmem:[#allocation2 + $0x70] sm:$0x22]  ;;  %v3379_v24 = vld [vmem:[%s4251_s3 + $0x1d8] sm:$0xff]  }
  0xf5   :  { %v334_v29 = vpop.f32.mrf.mxu0  ;;  %v847_v30 = vpop.f32.mrf.mxu1  ;;  %v2748_v35 = vcombine.high %v3880_v27, %v3880_v27  ;;  %v2750_v55 = vcombine.high %v3894_v44, %v3894_v44  ;;  %v3380_v26 = vld [vmem:[%s4251_s3 + $0x118] sm:$0xff]  }
  0xf6   :  { %v1111_v38 = vshrl.u32 %v2680_v31, 16  ;;  %v1066_v39 = vshll.u32 %v2682_v33, 16  ;;  %v1108_v40 = vshrl.u32 %v2679_v28, 16  ;;  %v1063_v42 = vshll.u32 %v2681_v32, 16  ;;  %v3381_v30 = vld [vmem:[%s4251_s3 + $0x198] sm:$0xff]  }
  0xf7   :  { %v336_v36 = vpop.f32.mrf.mxu0  ;;  %v849_v37 = vpop.f32.mrf.mxu1  ;;  %v1627_v56 = vshrl.u32 %v2748_v35, 16  ;;  %v1445_v59 = vshll.u32 %v2750_v55, 16  ;;  %v1633_v61 = vrot.slane %v2750_v55, 1  ;;  %v1432_v4 = vrot.slane %v2748_v35, 1 }
  0xf8   :  { %v1118_v47 = vsel %vm3882_vm2, %v1111_v38, %v2682_v33  ;;  %v1074_v48 = vsel %vm3882_vm2, %v2680_v31, %v1066_v39  ;;  %v1117_v49 = vsel %vm3882_vm2, %v1108_v40, %v2681_v32  ;;  %v1073_v52 = vsel %vm3882_vm2, %v2679_v28, %v1063_v42  ;;  %v3382_v31 = vld [vmem:[%s4251_s3 + $0x150] sm:$0xff]   ;;  %v636_v38 = vpop.permute.xlu0 %635 }
  0xf9   :  { %v338_v45 = vpop.f32.mrf.mxu0  ;;  %v851_v46 = vpop.f32.mrf.mxu1  ;;  %1280 = vmatprep.mubr.bf16.mxu0 %v1118_v47  ;;  %1416 = vmatprep.mubr.bf16.mxu1 %v1074_v48  ;;  %v1629_v60 = vrot.slane %v1627_v56, 1  ;;  %v1447_v5 = vrot.slane %v1445_v59, 1  ;;  %v3383_v32 = vld [vmem:[%s4251_s3 + $0x1d0] sm:$0xff]   ;;  %v3966_v33 = vcombine.low %v3894_v44, %v3894_v44  ;;  %v2747_v37 = vcombine.low %v3880_v27, %v3880_v27  ;;  %v3386_v27 = vld [vmem:[%s4251_s3 + $0x148] sm:$0xff]  }
  0xfa   :  { %1281 = vmatmul.mubr.bf16.vlgmr.msra.gmra.mxu0 %v1117_v49  ;;  %1417 = vmatmul.mubr.bf16.vlgmr.msra.gmra.mxu1 %v1073_v52  ;;  %v3384_v39 = vld [vmem:[%s4251_s3 + $0x110] sm:$0xff]   ;;  %v3981_v44 = vld [vmem:[#allocation2 + $0x68] sm:$0x44]  ;;  %v601_v47 = vpop.permute.xlu1 %600 }
  0xfb   :  { %v342_v53 = vpop.f32.mrf.mxu0  ;;  %v855_v54 = vpop.f32.mrf.mxu1  ;;  %3125 = vmatpush3.bf16.msra.mxu0 %v3362_v41  ;;  %3147 = vmatpush3.bf16.msra.mxu1 %v3363_v43  ;;  %v1637_v6 = vsel %vm3882_vm2, %v1629_v60, %v1633_v61  ;;  %v1451_v10 = vsel %vm3882_vm2, %v1432_v4, %v1447_v5  ;;  %v3973_v40 = vld [vmem:[#allocation2 + $0x70] sm:$0x44]  ;;  %v3387_v45 = vld [vmem:[%s4251_s3 + $0x1c8] sm:$0xff]   ;;  %v1441_v46 = vshll.u32 %v3966_v33, 16  ;;  %v1431_v59 = vrot.slane %v2747_v37, 1  ;;  %v3392_v5 = vld [vmem:[%s4251_s3 + $0x100] sm:$0xff]  }
  0xfc   :  { %3126 = vmatprep.subr.bf16.mxu0 %v3366_v50  ;;  %3148 = vmatprep.subr.bf16.mxu1 %v3367_v51  ;;  %v3385_v43 = vld [vmem:[%s4251_s3 + $0x190] sm:$0xff]   ;;  %v1623_v50 = vshrl.u32 %v2747_v37, 16  ;;  %v3989_v51 = vcombine.high %v3973_v40, %v3973_v40  ;;  %v3388_v52 = vld [vmem:[%s4251_s3 + $0x108] sm:$0xff]   ;;  %v2848_v53 = vcombine.high %v3981_v44, %v3981_v44  ;;  %v646_v4 = vpop.permute.xlu0 %645  ;;  %v3412_v47 = vld [vmem:[%s4251_s3 + $0x220] sm:$0xff]  }
  0xfd   :  { %v344_v62 = vpop.f32.mrf.mxu0  ;;  %v857_v63 = vpop.f32.mrf.mxu1  ;;  %1799 = vmatprep.mubr.bf16.mxu1 %v1637_v6  ;;  %1613 = vmatprep.mubr.bf16.mxu0 %v1451_v10  ;;  %v3389_v56 = vld [vmem:[%s4251_s3 + $0x188] sm:$0xff]   ;;  %v1443_v60 = vrot.slane %v1441_v46, 1  ;;  %v3396_v10 = vld [vmem:[%s4251_s3 + $0x278] sm:$0xff]  }
  0xfe   :  { %v611_v61 = vpop.permute.xlu1 %610  ;;  %v2011_v6 = vshrl.u32 %v2848_v53, 16  ;;  %v3406_v37 = vld [vmem:[%s4251_s3 + $0x268] sm:$0xff]  }
  0xff   :  { %v346_v7 = vpop.f32.mrf.mxu0  ;;  %v859_v8 = vpop.f32.mrf.mxu1  ;;  %3127 = vmatpush3.bf16.msra.mxu0 %v3368_v58  ;;  %3149 = vmatpush3.bf16.msra.mxu1 %v3369_v0  ;;  %v3391_v58 = vld [vmem:[%s4251_s3 + $0x1c0] sm:$0xff]   ;;  %v1625_v0 = vrot.slane %v1623_v50, 1  ;;  %v3407_v38 = vld [vmem:[%s4251_s3 + $0x2e8] sm:$0xff]   ;;  %v3415_v50 = vld [vmem:[%s4251_s3 + $0x2d8] sm:$0xff]  }
 0x100   :  { %3128 = vmatprep.subr.bf16.mxu0 %v3370_v1  ;;  %3150 = vmatprep.subr.bf16.mxu1 %v3371_v3  ;;  %v1632_v1 = vrot.slane %v3966_v33, 1  ;;  %v1829_v3 = vshll.u32 %v3989_v51, 16  ;;  %v3423_v61 = vld [vmem:[%s4251_s3 + $0x2c8] sm:$0xff]  }
 0x101   :  { %v348_v11 = vpop.f32.mrf.mxu0  ;;  %v861_v12 = vpop.f32.mrf.mxu1 }
 0x102   :  { %v1450_v11 = vsel %vm3882_vm2, %v1431_v59, %v1443_v60  ;;  %v3397_v12 = vld [vmem:[%s4251_s3 + $0x2f8] sm:$0xff]   ;;  %v4097_v59 = vld [vmem:[#allocation2 + $0x70] sm:$0x88] }
 0x103   :  { %v352_v16 = vpop.f32.mrf.mxu0  ;;  %v865_v17 = vpop.f32.mrf.mxu1  ;;  %3129 = vmatpush3.bf16.msra.mxu0 %v3372_v9  ;;  %3151 = vmatpush3.bf16.msra.mxu1 %v3373_v13  ;;  %v3393_v9 = vld [vmem:[%s4251_s3 + $0x180] sm:$0xff]   ;;  %v2950_v4 = vcombine.high %v4097_v59, %v4097_v59 }
 0x104   :  { %3130 = vmatprep.subr.bf16.mxu0 %v3374_v14  ;;  %3152 = vmatprep.subr.bf16.mxu1 %v3375_v15  ;;  %v1816_v15 = vrot.slane %v2848_v53, 2  ;;  %v1831_v16 = vrot.slane %v1829_v3, 2  ;;  %v3398_v17 = vld [vmem:[%s4251_s3 + $0x238] sm:$0xff]   ;;  %v3424_v3 = vld [vmem:[%s4251_s3 + $0x208] sm:$0xff]  }
 0x105   :  { %v354_v20 = vpop.f32.mrf.mxu0  ;;  %v867_v21 = vpop.f32.mrf.mxu1  ;;  %v3417_v53 = vld [vmem:[%s4251_s3 + $0x298] sm:$0xff]  }
 0x106   :  { %v1636_v20 = vsel %vm3882_vm2, %v1625_v0, %v1632_v1  ;;  %v3401_v21 = vld [vmem:[%s4251_s3 + $0x2b8] sm:$0xff]   ;;  %v2847_v0 = vcombine.low %v3981_v44, %v3981_v44 }
 0x107   :  { %v356_v25 = vpop.f32.mrf.mxu0  ;;  %v869_v2 = vpop.f32.mrf.mxu1  ;;  %3131 = vmatpush3.bf16.msra.mxu0 %v3376_v19  ;;  %3153 = vmatpush3.bf16.msra.mxu1 %v3377_v22  ;;  %v2013_v22 = vrot.slane %v2011_v6, 2  ;;  %v3427_v6 = vld [vmem:[%s4251_s3 + $0x2c0] sm:$0xff]  }
 0x108   :  { %3132 = vmatprep.subr.bf16.mxu0 %v3378_v23  ;;  %3154 = vmatprep.subr.bf16.mxu1 %v3379_v24  ;;  %v2017_v23 = vrot.slane %v3989_v51, 2  ;;  %v3402_v24 = vld [vmem:[%s4251_s3 + $0x270] sm:$0xff]   ;;  %v621_v25 = vpop.permute.xlu1 %620  ;;  %v1835_v2 = vsel %vm3882_vm2, %v1816_v15, %v1831_v16 }
 0x109   :  { %v871_v28 = vpop.f32.mrf.mxu1  ;;  %v358_v29 = vpop.f32.mrf.mxu0 }
 0x10a   :  { %v3403_v29 = vld [vmem:[%s4251_s3 + $0x2f0] sm:$0xff]  }
 0x10b   :  { %v362_v35 = vpop.f32.mrf.mxu0  ;;  %v875_v36 = vpop.f32.mrf.mxu1  ;;  %3133 = vmatpush3.bf16.msra.mxu0 %v3380_v26  ;;  %3155 = vmatpush3.bf16.msra.mxu1 %v3381_v30 }
 0x10c   :  { %3134 = vmatprep.subr.bf16.mxu0 %v3382_v31  ;;  %3156 = vmatprep.subr.bf16.mxu1 %v3383_v32  ;;  %v656_v30 = vpop.permute.xlu0 %655  ;;  %v3404_v31 = vld [vmem:[%s4251_s3 + $0x230] sm:$0xff]   ;;  %v2021_v32 = vsel %vm3882_vm2, %v2013_v22, %v2017_v23  ;;  %v631_v46 = vpop.permute.xlu1 %630  ;;  %v3437_v23 = vld [vmem:[%s4251_s3 + $0x3b8] sm:$0xff]  }
 0x10d   :  { %v364_v41 = vpop.f32.mrf.mxu0  ;;  %v877_v42 = vpop.f32.mrf.mxu1  ;;  %v3405_v36 = vld [vmem:[%s4251_s3 + $0x2b0] sm:$0xff]   ;;  %v3451_v46 = vld [vmem:[%s4251_s3 + $0x3d8] sm:$0xff]  }
 0x10e   :  { %v3408_v41 = vld [vmem:[%s4251_s3 + $0x228] sm:$0xff]   ;;  %v3439_v30 = vld [vmem:[%s4251_s3 + $0x3f0] sm:$0xff]  }
 0x10f   :  { %v366_v48 = vpop.f32.mrf.mxu0  ;;  %v879_v49 = vpop.f32.mrf.mxu1  ;;  %3135 = vmatpush3.bf16.msra.mxu0 %v3384_v39  ;;  %3157 = vmatpush3.bf16.msra.mxu1 %v3385_v43  ;;  %v3409_v43 = vld [vmem:[%s4251_s3 + $0x2a8] sm:$0xff]  }
 0x110   :  { %3136 = vmatprep.subr.bf16.mxu0 %v3386_v27  ;;  %3158 = vmatprep.subr.bf16.mxu1 %v3387_v45  ;;  %v3410_v27 = vld [vmem:[%s4251_s3 + $0x260] sm:$0xff]   ;;  %v3414_v49 = vld [vmem:[%s4251_s3 + $0x258] sm:$0xff]   ;;  %v641_v51 = vpop.permute.xlu1 %640 }
 0x111   :  { %v881_v54 = vpop.f32.mrf.mxu1  ;;  %v368_v55 = vpop.f32.mrf.mxu0  ;;  %v3411_v45 = vld [vmem:[%s4251_s3 + $0x2e0] sm:$0xff]   ;;  %v3456_v51 = vld [vmem:[%s4251_s3 + $0x310] sm:$0xff]  }
 0x112   :  { %v3413_v48 = vld [vmem:[%s4251_s3 + $0x2a0] sm:$0xff]   ;;  %v3418_v54 = vld [vmem:[%s4251_s3 + $0x250] sm:$0xff]  }
 0x113   :  { %v372_v62 = vpop.f32.mrf.mxu0  ;;  %v885_v63 = vpop.f32.mrf.mxu1  ;;  %3137 = vmatpush3.bf16.msra.mxu0 %v3388_v52  ;;  %3159 = vmatpush3.bf16.msra.mxu1 %v3389_v56  ;;  %v3416_v52 = vld [vmem:[%s4251_s3 + $0x218] sm:$0xff]   ;;  %v3419_v55 = vld [vmem:[%s4251_s3 + $0x2d0] sm:$0xff]  }
 0x114   :  { %3138 = vmatprep.subr.bf16.mxu0 %v3390_v57  ;;  %3160 = vmatprep.subr.bf16.mxu1 %v3391_v58  ;;  %v3420_v56 = vld [vmem:[%s4251_s3 + $0x210] sm:$0xff]   ;;  %v3422_v58 = vld [vmem:[%s4251_s3 + $0x248] sm:$0xff]   ;;  %v651_v60 = vpop.permute.xlu1 %650  ;;  %v2849_v62 = vcombine.low %v3973_v40, %v3973_v40 }
 0x115   :  { %v374_v7 = vpop.f32.mrf.mxu0  ;;  %v887_v8 = vpop.f32.mrf.mxu1  ;;  %v3421_v57 = vld [vmem:[%s4251_s3 + $0x290] sm:$0xff]   ;;  %v4104_v63 = vld [vmem:[#allocation2 + $0x68] sm:$0x88]  ;;  %v3462_v60 = vld [vmem:[%s4251_s3 + $0x340] sm:$0xff]  }
 0x116   :  { %v3425_v40 = vld [vmem:[%s4251_s3 + $0x288] sm:$0xff]   ;;  %v2948_v44 = vcombine.high %v4104_v63, %v4104_v63  ;;  %v1825_v7 = vshll.u32 %v2849_v62, 16  ;;  %v2007_v8 = vshrl.u32 %v2847_v0, 16  ;;  %v2016_v22 = vrot.slane %v2849_v62, 2 }
 0x117   :  { %v376_v13 = vpop.f32.mrf.mxu0  ;;  %v889_v14 = vpop.f32.mrf.mxu1  ;;  %3139 = vmatpush3.bf16.msra.mxu0 %v3392_v5  ;;  %3161 = vmatpush3.bf16.msra.mxu1 %v3393_v9  ;;  %v3426_v5 = vld [vmem:[%s4251_s3 + $0x240] sm:$0xff]  }
 0x118   :  { %3168 = vmatprep.subr.bf16.mxu0 %v3396_v10  ;;  %3190 = vmatprep.subr.bf16.mxu1 %v3397_v12  ;;  %v3428_v10 = vld [vmem:[%s4251_s3 + $0x200] sm:$0xff]   ;;  %v3432_v13 = vld [vmem:[%s4251_s3 + $0x378] sm:$0xff]   ;;  %v2395_v14 = vshrl.u32 %v2948_v44, 16  ;;  %v661_v15 = vpop.permute.xlu1 %660  ;;  %v1827_v16 = vrot.slane %v1825_v7, 2 }
 0x119   :  { %v891_v18 = vpop.f32.mrf.mxu1  ;;  %v378_v19 = vpop.f32.mrf.mxu0  ;;  %v3429_v12 = vld [vmem:[%s4251_s3 + $0x280] sm:$0xff]  }
 0x11a   :  { %1614 = vmatmul.mubr.bf16.vlgmr.msra.gmra.mxu0 %v1450_v11  ;;  %1800 = vmatmul.mubr.bf16.vlgmr.msra.gmra.mxu1 %v1636_v20  ;;  %v2213_v11 = vshll.u32 %v2950_v4, 16  ;;  %v2009_v18 = vrot.slane %v2007_v8, 2  ;;  %v1815_v19 = vrot.slane %v2847_v0, 2  ;;  %v3434_v20 = vld [vmem:[%s4251_s3 + $0x338] sm:$0xff]   ;;  %v3465_v0 = vld [vmem:[%s4251_s3 + $0x380] sm:$0xff]  }
 0x11b   :  { %v382_v26 = vpop.f32.mrf.mxu0  ;;  %v895_v28 = vpop.f32.mrf.mxu1  ;;  %3169 = vmatpush3.bf16.msra.mxu0 %v3398_v17  ;;  %1997 = vmatprep.mubr.bf16.mxu0 %v1835_v2  ;;  %v3433_v17 = vld [vmem:[%s4251_s3 + $0x3f8] sm:$0xff]   ;;  %v2200_v2 = vrot.slane %v2948_v44, 3 }
 0x11c   :  { %3191 = vmatpush3.bf16.msra.mxu1 %v3401_v21  ;;  %2183 = vmatprep.mubr.bf16.mxu1 %v2021_v32  ;;  %v2215_v21 = vrot.slane %v2213_v11, 3  ;;  %v1834_v25 = vsel %vm3882_vm2, %v1815_v19, %v1827_v16  ;;  %v3438_v26 = vld [vmem:[%s4251_s3 + $0x370] sm:$0xff]   ;;  %v2020_v28 = vsel %vm3882_vm2, %v2009_v18, %v2016_v22 }
 0x11d   :  { %v384_v33 = vpop.f32.mrf.mxu0  ;;  %v897_v35 = vpop.f32.mrf.mxu1  ;;  %3170 = vmatprep.subr.bf16.mxu0 %v3402_v24  ;;  %3192 = vmatprep.subr.bf16.mxu1 %v3403_v29  ;;  %v2397_v24 = vrot.slane %v2395_v14, 3  ;;  %v2401_v29 = vrot.slane %v2950_v4, 3  ;;  %v3440_v32 = vld [vmem:[%s4251_s3 + $0x330] sm:$0xff]  }
 0x11e   :  { %v3441_v35 = vld [vmem:[%s4251_s3 + $0x3b0] sm:$0xff]  }
 0x11f   :  { %v386_v39 = vpop.f32.mrf.mxu0  ;;  %3171 = vmatpush3.bf16.msra.mxu0 %v3404_v31  ;;  %v899_v1 = vpop.f32.mrf.mxu1  ;;  %v2219_v31 = vsel %vm3882_vm2, %v2200_v2, %v2215_v21  ;;  %v2405_v33 = vsel %vm3882_vm2, %v2397_v24, %v2401_v29 }
 0x120   :  { %3193 = vmatpush3.bf16.msra.mxu1 %v3405_v36  ;;  %3172 = vmatprep.subr.bf16.mxu0 %v3406_v37  ;;  %v3442_v36 = vld [vmem:[%s4251_s3 + $0x368] sm:$0xff]  }
 0x121   :  { %v388_v42 = vpop.f32.mrf.mxu0  ;;  %3194 = vmatprep.subr.bf16.mxu1 %v3407_v38  ;;  %v901_v9 = vpop.f32.mrf.mxu1  ;;  %v3443_v37 = vld [vmem:[%s4251_s3 + $0x3e8] sm:$0xff]  }
 0x122   :  { %v3444_v38 = vld [vmem:[%s4251_s3 + $0x328] sm:$0xff]   ;;  %v3447_v42 = vld [vmem:[%s4251_s3 + $0x3e0] sm:$0xff]  }
 0x123   :  { %3173 = vmatpush3.bf16.msra.mxu0 %v3408_v41  ;;  %v3445_v39 = vld [vmem:[%s4251_s3 + $0x3a8] sm:$0xff]   ;;  %v3446_v41 = vld [vmem:[%s4251_s3 + $0x360] sm:$0xff]  }
 0x124   :  { %3195 = vmatpush3.bf16.msra.mxu1 %v3409_v43  ;;  %3174 = vmatprep.subr.bf16.mxu0 %v3410_v27  ;;  %v3448_v43 = vld [vmem:[%s4251_s3 + $0x320] sm:$0xff]  }
 0x125   :  { %3196 = vmatprep.subr.bf16.mxu1 %v3411_v45  ;;  %v3449_v27 = vld [vmem:[%s4251_s3 + $0x3a0] sm:$0xff]   ;;  %v3450_v45 = vld [vmem:[%s4251_s3 + $0x358] sm:$0xff]  }
 0x127   :  { %3175 = vmatpush3.bf16.msra.mxu0 %v3412_v47  ;;  %v3452_v47 = vld [vmem:[%s4251_s3 + $0x318] sm:$0xff]  }
 0x128   :  { %3197 = vmatpush3.bf16.msra.mxu1 %v3413_v48  ;;  %3176 = vmatprep.subr.bf16.mxu0 %v3414_v49  ;;  %v3453_v48 = vld [vmem:[%s4251_s3 + $0x398] sm:$0xff]   ;;  %v3454_v49 = vld [vmem:[%s4251_s3 + $0x350] sm:$0xff]  }
 0x129   :  { %3198 = vmatprep.subr.bf16.mxu1 %v3415_v50  ;;  %v3455_v50 = vld [vmem:[%s4251_s3 + $0x3d0] sm:$0xff]  }
 0x12b   :  { %3177 = vmatpush3.bf16.msra.mxu0 %v3416_v52  ;;  %v3457_v52 = vld [vmem:[%s4251_s3 + $0x390] sm:$0xff]  }
 0x12c   :  { %3199 = vmatpush3.bf16.msra.mxu1 %v3417_v53  ;;  %3178 = vmatprep.subr.bf16.mxu0 %v3418_v54  ;;  %v3458_v53 = vld [vmem:[%s4251_s3 + $0x348] sm:$0xff]  }
 0x12d   :  { %3200 = vmatprep.subr.bf16.mxu1 %v3419_v55  ;;  %v3459_v54 = vld [vmem:[%s4251_s3 + $0x3c8] sm:$0xff]   ;;  %v2949_v55 = vcombine.low %v4097_v59, %v4097_v59  ;;  %v3463_v59 = vld [vmem:[%s4251_s3 + $0x3c0] sm:$0xff]  }
 0x12f   :  { %3179 = vmatpush3.bf16.msra.mxu0 %v3420_v56  ;;  %v2947_v56 = vcombine.low %v4104_v63, %v4104_v63  ;;  %v3464_v63 = vld [vmem:[%s4251_s3 + $0x300] sm:$0xff]  }
 0x130   :  { %3201 = vmatpush3.bf16.msra.mxu1 %v3421_v57  ;;  %3180 = vmatprep.subr.bf16.mxu0 %v3422_v58  ;;  %v3460_v57 = vld [vmem:[%s4251_s3 + $0x308] sm:$0xff]  }
 0x131   :  { %3202 = vmatprep.subr.bf16.mxu1 %v3423_v61  ;;  %v3461_v58 = vld [vmem:[%s4251_s3 + $0x388] sm:$0xff]   ;;  %v2209_v61 = vshll.u32 %v2949_v55, 16  ;;  %v2391_v62 = vshrl.u32 %v2947_v56, 16  ;;  %v2199_v4 = vrot.slane %v2947_v56, 3 }
 0x133   :  { %3181 = vmatpush3.bf16.msra.mxu0 %v3424_v3  ;;  %v2211_v1 = vrot.slane %v2209_v61, 3  ;;  %v2393_v3 = vrot.slane %v2391_v62, 3 }
 0x134   :  { %3203 = vmatpush3.bf16.msra.mxu1 %v3425_v40  ;;  %3182 = vmatprep.subr.bf16.mxu0 %v3426_v5  ;;  %v2400_v40 = vrot.slane %v2949_v55, 3 }
 0x135   :  { %3204 = vmatprep.subr.bf16.mxu1 %v3427_v6  ;;  %v2218_v5 = vsel %vm3882_vm2, %v2199_v4, %v2211_v1 }
 0x136   :  { %v2404_v44 = vsel %vm3882_vm2, %v2393_v3, %v2400_v40 }
 0x137   :  { %3183 = vmatpush3.bf16.msra.mxu0 %v3428_v10 }
 0x138   :  { %3205 = vmatpush3.bf16.msra.mxu1 %v3429_v12  ;;  %3212 = vmatprep.subr.bf16.mxu0 %v3432_v13 }
 0x139   :  { %3234 = vmatprep.subr.bf16.mxu1 %v3433_v17 }
 0x13a   :  { %1998 = vmatmul.mubr.bf16.vlgmr.msra.gmra.mxu0 %v1834_v25 }
 0x13b   :  { %2184 = vmatmul.mubr.bf16.vlgmr.msra.gmra.mxu1 %v2020_v28  ;;  %3213 = vmatpush3.bf16.msra.mxu0 %v3434_v20 }
 0x13c   :  { %2381 = vmatprep.mubr.bf16.mxu0 %v2219_v31  ;;  %3235 = vmatpush3.bf16.msra.mxu1 %v3437_v23 }
 0x13d   :  { %2567 = vmatprep.mubr.bf16.mxu1 %v2405_v33  ;;  %3214 = vmatprep.subr.bf16.mxu0 %v3438_v26 }
 0x13e   :  { %3236 = vmatprep.subr.bf16.mxu1 %v3439_v30 }
 0x13f   :  { %3215 = vmatpush3.bf16.msra.mxu0 %v3440_v32 }
 0x140   :  { %3237 = vmatpush3.bf16.msra.mxu1 %v3441_v35  ;;  %3216 = vmatprep.subr.bf16.mxu0 %v3442_v36 }
 0x141   :  { %3238 = vmatprep.subr.bf16.mxu1 %v3443_v37 }
 0x143   :  { %3217 = vmatpush3.bf16.msra.mxu0 %v3444_v38 }
 0x144   :  { %3239 = vmatpush3.bf16.msra.mxu1 %v3445_v39  ;;  %3218 = vmatprep.subr.bf16.mxu0 %v3446_v41 }
 0x145   :  { %3240 = vmatprep.subr.bf16.mxu1 %v3447_v42 }
 0x147   :  { %3219 = vmatpush3.bf16.msra.mxu0 %v3448_v43 }
 0x148   :  { %3241 = vmatpush3.bf16.msra.mxu1 %v3449_v27  ;;  %3220 = vmatprep.subr.bf16.mxu0 %v3450_v45 }
 0x149   :  { %3242 = vmatprep.subr.bf16.mxu1 %v3451_v46 }
 0x14b   :  { %3221 = vmatpush3.bf16.msra.mxu0 %v3452_v47 }
 0x14c   :  { %3243 = vmatpush3.bf16.msra.mxu1 %v3453_v48  ;;  %3222 = vmatprep.subr.bf16.mxu0 %v3454_v49 }
 0x14d   :  { %3244 = vmatprep.subr.bf16.mxu1 %v3455_v50 }
 0x14f   :  { %3223 = vmatpush3.bf16.msra.mxu0 %v3456_v51 }
 0x150   :  { %3245 = vmatpush3.bf16.msra.mxu1 %v3457_v52  ;;  %3224 = vmatprep.subr.bf16.mxu0 %v3458_v53  ;;  %v3047_v52 = vld [vmem:[%s4252_s4] ss:$0 sm:$0xff] }
 0x151   :  { %3246 = vmatprep.subr.bf16.mxu1 %v3459_v54 }
 0x153   :  { %3225 = vmatpush3.bf16.msra.mxu0 %v3460_v57 }
 0x154   :  { %3247 = vmatpush3.bf16.msra.mxu1 %v3461_v58  ;;  %3226 = vmatprep.subr.bf16.mxu0 %v3462_v60 }
 0x155   :  { %3248 = vmatprep.subr.bf16.mxu1 %v3463_v59 }
 0x157   :  { %3227 = vmatpush3.bf16.msra.mxu0 %v3464_v63 }
 0x158   :  { %3249 = vmatpush3.bf16.msra.mxu1 %v3465_v0 }
 0x15a   :  { %2382 = vmatmul.mubr.bf16.vlgmr.msra.gmra.mxu0 %v2218_v5 }
 0x15b   :  { %2568 = vmatmul.mubr.bf16.vlgmr.msra.gmra.mxu1 %v2404_v44 }
 0x1ba   :  { %v3096_v6 = vpop.f32.mrf.mxu0  ;;  %v3118_v7 = vpop.f32.mrf.mxu1 }
 0x1bc   :  { %v3097_v8 = vpop.f32.mrf.mxu0  ;;  %v3119_v9 = vpop.f32.mrf.mxu1 }
 0x1bd   :  { %v3098_v10 = vadd.f32 %v3097_v8, %v3096_v6  ;;  %v3120_v11 = vadd.f32 %v3119_v9, %v3118_v7 }
 0x1be   :  { %v3099_v12 = vpop.f32.mrf.mxu0  ;;  %v3121_v13 = vpop.f32.mrf.mxu1 }
 0x1bf   :  { %v1419_v14 = vadd.f32 %v3120_v11, %v3098_v10 }
 0x1c0   :  { %v3100_v15 = vpop.f32.mrf.mxu0  ;;  %v3122_v16 = vpop.f32.mrf.mxu1 }
 0x1da   :  { %v3140_v17 = vpop.f32.mrf.mxu0  ;;  %v3162_v18 = vpop.f32.mrf.mxu1 }
 0x1dc   :  { %v3141_v19 = vpop.f32.mrf.mxu0  ;;  %v3163_v20 = vpop.f32.mrf.mxu1 }
 0x1dd   :  { %v3142_v32 = vadd.f32 %v3141_v19, %v3140_v17  ;;  %v3164_v35 = vadd.f32 %v3163_v20, %v3162_v18 }
 0x1de   :  { %v3143_v21 = vpop.f32.mrf.mxu0  ;;  %v3165_v22 = vpop.f32.mrf.mxu1 }
 0x1df   :  { %v1621_v33 = vadd.f32 %v3142_v32, %v1419_v14 }
 0x1e0   :  { %v3144_v34 = vpop.f32.mrf.mxu0  ;;  %v3166_v23 = vpop.f32.mrf.mxu1 }
 0x1e1   :  { %v1807_v37 = vadd.f32 %v3164_v35, %v1621_v33 }
 0x1fa   :  { %v3184_v24 = vpop.f32.mrf.mxu0 }
 0x1fb   :  { %v3206_v25 = vpop.f32.mrf.mxu1 }
 0x1fc   :  { %v3185_v2 = vpop.f32.mrf.mxu0 }
 0x1fd   :  { %v3207_v26 = vpop.f32.mrf.mxu1  ;;  %v3186_v36 = vadd.f32 %v3185_v2, %v3184_v24 }
 0x1fe   :  { %v3187_v28 = vpop.f32.mrf.mxu0  ;;  %v3208_v41 = vadd.f32 %v3207_v26, %v3206_v25 }
 0x1ff   :  { %v3209_v29 = vpop.f32.mrf.mxu1  ;;  %v2005_v38 = vadd.f32 %v3186_v36, %v1807_v37 }
 0x200   :  { %v3188_v30 = vpop.f32.mrf.mxu0 }
 0x201   :  { %v3210_v31 = vpop.f32.mrf.mxu1  ;;  %v2191_v27 = vadd.f32 %v3208_v41, %v2005_v38 }
 0x21a   :  { %v3228_v39 = vpop.f32.mrf.mxu0 }
 0x21b   :  { %v3250_v42 = vpop.f32.mrf.mxu1 }
 0x21c   :  { %v3229_v43 = vpop.f32.mrf.mxu0 }
 0x21d   :  { %v3230_v45 = vadd.f32 %v3229_v43, %v3228_v39  ;;  %v3251_v46 = vpop.f32.mrf.mxu1 }
 0x21e   :  { %v3231_v47 = vpop.f32.mrf.mxu0  ;;  %v3252_v49 = vadd.f32 %v3251_v46, %v3250_v42 }
 0x21f   :  { %v2389_v48 = vadd.f32 %v3230_v45, %v2191_v27  ;;  %v3253_v50 = vpop.f32.mrf.mxu1 }
 0x220   :  { %v3232_v51 = vpop.f32.mrf.mxu0 }
 0x221   :  { %v2575_v53 = vadd.f32 %v3252_v49, %v2389_v48  ;;  %v3254_v54 = vpop.f32.mrf.mxu1 }
 0x223   :  { %v2583_v55 = vadd.f32 %v3047_v52, %v2575_v53 }
 0x225   :  { %2584 = vst [vmem:[#allocation3] sm:$0x3] %v2583_v55 }
 0x226   :  { %3479 = shalt.err (!%p3476_p4)
}
 0x227   :  { %2594 = dma.vmem_to_hbm [thread:$0]  %s2592_s14, 32, %s4253_s5, [#allocation4]  }
 0x228   :  { %3488 = dma.done.wait [#allocation4], 32  }
 0x229   :  { %3489 = vsyncadd [#allocation4], 4294967264 }
 0x22a   :  { %2598 = vsyncpa [#allocation4], 1 }

</bundles_post_ra>
